<compile_context>
chip_gen: v6e
topology: v6e:2x2x1
jax: 0.10.0
libtpu: 0.0.40
codegen_flags: <defaults>
</compile_context>

<pallas_src>
import functools

import jax
import jax.numpy as jnp
from jax import lax
from jax.experimental import pallas as pl
from jax.experimental.pallas import tpu as pltpu

_LANES = 128
_SUBLANES = 8
_MAX_BLOCK_ROWS = 4096          # (4096, 128) f32 block = 2 MiB per input


def _sublane_multiple(dtype):
    itemsize = jnp.dtype(dtype).itemsize
    return {4: 8, 2: 16, 1: 32}.get(itemsize, 8)


def _pick_rows_per_iter(block_rows, sub_mult):
    # Largest chunk (<= 64 rows, >= dtype sublane multiple) dividing the block.
    for cand in (64, 32, 16, 8):
        if cand >= sub_mult and block_rows % cand == 0:
            return cand
    return sub_mult


def _is_v7x():
    try:
        kind = jax.devices()[0].device_kind.lower()
    except Exception:
        return False
    return "v7" in kind


def _compiler_params(semantics, block_rows, itemsize):
    block_bytes = block_rows * _LANES * itemsize
    # 3 inputs x 2 pipeline buffers + headroom; clamp to a safe ceiling.
    vmem = min(64 * 1024 * 1024,
               max(16 * 1024 * 1024, 3 * 2 * block_bytes + (8 << 20)))
    return pltpu.CompilerParams(dimension_semantics=semantics,
                                vmem_limit_bytes=int(vmem))


def _cost_estimate(n_elems, in_arrays, out_bytes):
    bytes_in = sum(int(a.size) * jnp.dtype(a.dtype).itemsize for a in in_arrays)
    return pl.CostEstimate(flops=4 * int(n_elems), transcendentals=0,
                           bytes_accessed=bytes_in + int(out_bytes))


def _block_partial_sum(x_ref, xi_ref, c_ref, start_row, *, block_rows,
                       rows_per_iter, rows_valid, need_mask):
    """(8,128) f32 partial of sum(|x - xi| * c) over one (block_rows,128) tile.

    `start_row` is the tile's absolute first row; rows >= rows_valid are
    masked out (only the ragged last tile / phantom clamped tiles need it).
    """
    groups = rows_per_iter // _SUBLANES
    n_iters = block_rows // rows_per_iter

    def body(it, acc):
        off = it * rows_per_iter
        if not isinstance(off, int):
            off = pl.multiple_of(off, rows_per_iter)
        sl = pl.ds(off, rows_per_iter)
        xv = x_ref[sl, :].astype(jnp.float32)
        xiv = xi_ref[sl, :].astype(jnp.float32)
        cv = c_ref[sl, :].astype(jnp.float32)
        prod = jnp.abs(xv - xiv) * cv                       # pure VPU
        if need_mask:
            rid = start_row + off + lax.broadcasted_iota(
                jnp.int32, (rows_per_iter, _LANES), 0)
            prod = jnp.where(rid < rows_valid, prod, 0.0)
        # Splits the sublane-major axis exactly on (8,128) vreg boundaries:
        # the reduce is `groups` vreg adds, no relayout / VMEM temporary.
        return acc + jnp.sum(prod.reshape(groups, _SUBLANES, _LANES), axis=0)

    init = jnp.zeros((_SUBLANES, _LANES), jnp.float32)
    return lax.fori_loop(0, n_iters, body, init, unroll=(n_iters <= 8))


def _fused_kernel(x_ref, xi_ref, c_ref, prob_ref, u_ref,
                  loss_ref, cost_ref, acc_ref, *,
                  block_rows, rows_per_iter, rows_valid, need_mask,
                  lagrange, budget):
    """Single-core path: streaming reduction + fused scalar epilogue."""
    i = pl.program_id(0)

    @pl.when(i == 0)
    def _init():
        acc_ref[...] = jnp.zeros_like(acc_ref)

    acc_ref[...] += _block_partial_sum(
        x_ref, xi_ref, c_ref, i * block_rows,
        block_rows=block_rows, rows_per_iter=rows_per_iter,
        rows_valid=rows_valid, need_mask=need_mask)

    @pl.when(i == pl.num_programs(0) - 1)
    def _finalize():
        cost = jnp.sum(acc_ref[...])                 # one-time XLU reduce
        pu = jnp.sum(prob_ref[...].astype(jnp.float32) *
                     u_ref[...].astype(jnp.float32))
        loss = pu + lagrange * jnp.maximum(cost - budget, 0.0)
        cost_ref[0, 0] = cost
        loss_ref[0, 0] = loss


def _partials_kernel(x_ref, xi_ref, c_ref, part_ref, *,
                     block_rows, rows_per_iter, rows_valid, need_mask,
                     num_cores):
    """General path: per-core (8,128) partials; epilogue in the wrapper."""
    p = pl.program_id(0)
    i = pl.program_id(1)

    @pl.when(i == 0)
    def _init():
        part_ref[...] = jnp.zeros_like(part_ref)

    blk = i * num_cores + p          # interleaved tile ownership across cores
    part_ref[...] += _block_partial_sum(
        x_ref, xi_ref, c_ref, blk * block_rows,
        block_rows=block_rows, rows_per_iter=rows_per_iter,
        rows_valid=rows_valid, need_mask=need_mask)


def my_loss_reg(prob, u, x, x_init, c, lagrange, budget):
    """Returns (loss, cost) scalars, matching MyLossReg.forward.

    `lagrange` / `budget` are static Python floats (module constants).
    """
    assert x.shape == x_init.shape == c.shape
    assert prob.shape == u.shape and prob.ndim == 1

    lagrange = float(lagrange)
    budget = float(budget)
    f32 = jnp.float32

    x_flat = jnp.ravel(x)
    xi_flat = jnp.ravel(x_init)
    c_flat = jnp.ravel(c)
    n = x_flat.shape[0]

    sub_mult = max(_sublane_multiple(x.dtype), _sublane_multiple(x_init.dtype),
                   _sublane_multiple(c.dtype))
    granule = sub_mult * _LANES
    n_kernel = (n // granule) * granule

    def epilogue(cost):
        pu = jnp.dot(prob.astype(f32), u.astype(f32))
        loss = pu + f32(lagrange) * jnp.maximum(cost - f32(budget), f32(0.0))
        return loss, cost

    # Tiny problems: Pallas dispatch is not worth it; plain jnp.
    if n_kernel == 0:
        cost = jnp.dot(jnp.abs(x_flat.astype(f32) - xi_flat.astype(f32)),
                       c_flat.astype(f32))
        return epilogue(cost)

    # Elements past the last whole (sub_mult x 128) row group: reduce with a
    # tiny jnp epilogue (< granule elements).  No jnp.pad anywhere.
    has_tail = n_kernel != n
    if has_tail:
        # TODO(synk): when n is not a multiple of sub_mult*128 the prefix slice
        # still copies the main body; a fully copy-free ragged path would need
        # manual 1-D DMA with lane masking.
        x_main, xi_main, c_main = (a[:n_kernel] for a in (x_flat, xi_flat, c_flat))
        cost_tail = jnp.dot(
            jnp.abs(x_flat[n_kernel:].astype(f32) -
                    xi_flat[n_kernel:].astype(f32)),
            c_flat[n_kernel:].astype(f32))
    else:
        x_main, xi_main, c_main = x_flat, xi_flat, c_flat
        cost_tail = None

    rows = n_kernel // _LANES                     # multiple of sub_mult
    x2 = x_main.reshape(rows, _LANES)
    xi2 = xi_main.reshape(rows, _LANES)
    c2 = c_main.reshape(rows, _LANES)

    # 2-way TensorCore split only on v7x (CORE_PARALLEL; plain "parallel"
    # does not split cores) and only when each core streams full-size tiles.
    num_cores = 2 if (_is_v7x() and rows >= 2 * _MAX_BLOCK_ROWS) else 1

    block_rows = min(_MAX_BLOCK_ROWS, rows)
    rows_per_iter = _pick_rows_per_iter(block_rows, sub_mult)
    total_tiles = pl.cdiv(rows, block_rows)
    tiles_per_core = pl.cdiv(total_tiles, num_cores)
    covered_rows = num_cores * tiles_per_core * block_rows
    need_mask = covered_rows != rows
    itemsize = max(jnp.dtype(a.dtype).itemsize for a in (x2, xi2, c2))

    if num_cores == 1 and not has_tail:
        # Single Pallas call: streaming reduction + fused scalar epilogue.
        kernel = functools.partial(
            _fused_kernel, block_rows=block_rows, rows_per_iter=rows_per_iter,
            rows_valid=rows, need_mask=need_mask,
            lagrange=lagrange, budget=budget)
        L = prob.shape[0]
        prob2 = prob.reshape(1, L)
        u2 = u.reshape(1, L)
        in_spec = pl.BlockSpec((block_rows, _LANES), lambda i: (i, 0))
        small_spec = pl.BlockSpec((1, L), lambda i: (0, 0))
        smem_out = pl.BlockSpec(memory_space=pltpu.MemorySpace.SMEM)
        loss_out, cost_out = pl.pallas_call(
            kernel,
            out_shape=(jax.ShapeDtypeStruct((1, 1), f32),
                       jax.ShapeDtypeStruct((1, 1), f32)),
            grid=(total_tiles,),
            in_specs=[in_spec, in_spec, in_spec, small_spec, small_spec],
            out_specs=(smem_out, smem_out),
            scratch_shapes=[pltpu.VMEM((_SUBLANES, _LANES), f32)],
            compiler_params=_compiler_params(("arbitrary",), block_rows,
                                             itemsize),
            cost_estimate=_cost_estimate(n_kernel, (x2, xi2, c2), 8),
        )(x2, xi2, c2, prob2, u2)
        return loss_out[0, 0], cost_out[0, 0]

    # General path: per-core (8,128) partials, scalar epilogue in the wrapper
    # (required when the two v7x cores' partials must be combined anyway).
    kernel = functools.partial(
        _partials_kernel, block_rows=block_rows, rows_per_iter=rows_per_iter,
        rows_valid=rows, need_mask=need_mask, num_cores=num_cores)

    def in_map(p, i):
        blk = i * num_cores + p
        # Clamp the (at most one) phantom tile onto a valid tile; its rows are
        # fully masked inside the kernel so it contributes zero.
        return (jnp.minimum(blk, total_tiles - 1), 0)

    in_spec = pl.BlockSpec((block_rows, _LANES), in_map)
    out_spec = pl.BlockSpec((_SUBLANES, _LANES), lambda p, i: (p, 0))
    if num_cores == 2:
        semantics = (pltpu.CORE_PARALLEL, pltpu.ARBITRARY)
    else:
        semantics = ("arbitrary", "arbitrary")

    partials = pl.pallas_call(
        kernel,
        out_shape=jax.ShapeDtypeStruct((num_cores * _SUBLANES, _LANES), f32),
        grid=(num_cores, tiles_per_core),
        in_specs=[in_spec, in_spec, in_spec],
        out_specs=out_spec,
        compiler_params=_compiler_params(semantics, block_rows, itemsize),
        cost_estimate=_cost_estimate(n_kernel, (x2, xi2, c2),
                                     num_cores * _SUBLANES * _LANES * 4),
    )(x2, xi2, c2)

    cost = jnp.sum(partials)
    if cost_tail is not None:
        cost = cost + cost_tail
    return epilogue(cost)


if __name__ == "__main__":
    key = jax.random.PRNGKey(0)
    k1, k2, k3, k4, k5 = jax.random.split(key, 5)

    # Small shapes consistent with the module: x is NCHW, prob/u are vectors.
    B, C, H, W = 2, 4, 16, 16   # 2*4*16*16 = 2048 elements
    L = 8

    x = jax.random.normal(k1, (B, C, H, W), dtype=jnp.float32)
    x_init = jax.random.normal(k2, (B, C, H, W), dtype=jnp.float32)
    c = jax.random.uniform(k3, (B, C, H, W), dtype=jnp.float32)
    prob = jax.nn.softmax(jax.random.normal(k4, (L,), dtype=jnp.float32))
    u = jax.random.normal(k5, (L,), dtype=jnp.float32)

    lagrange = 0.5
    budget = 10.0

    loss, cost = my_loss_reg(prob, u, x, x_init, c, lagrange, budget)
    loss, cost = jax.block_until_ready((loss, cost))

    # Pure-JAX reference check of forward semantics (f32 accumulation order
    # differs, so allow a small tolerance).
    diff = jnp.abs(x - x_init)
    cost_ref = jnp.dot(diff.ravel(), c.ravel())
    loss_ref = jnp.dot(prob, u) + lagrange * jnp.maximum(cost_ref - budget, 0.0)
    assert jnp.allclose(loss, loss_ref, rtol=1e-4, atol=1e-4), (loss, loss_ref)
    assert jnp.allclose(cost, cost_ref, rtol=1e-4, atol=1e-4), (cost, cost_ref)

    print("KERNEL_OK")
</pallas_src>

<mosaic_0001>
module attributes {stable_mosaic.version = 11 : i64} {
  func.func @_fused_kernel(%arg0: i32, %arg1: memref<16x128xf32, #tpu.memory_space<vmem>>, %arg2: memref<16x128xf32, #tpu.memory_space<vmem>>, %arg3: memref<16x128xf32, #tpu.memory_space<vmem>>, %arg4: memref<1x8xf32, #tpu.memory_space<vmem>>, %arg5: memref<1x8xf32, #tpu.memory_space<vmem>>, %arg6: memref<1x1xf32, #tpu.memory_space<smem>>, %arg7: memref<1x1xf32, #tpu.memory_space<smem>>, %arg8: memref<8x128xf32, #tpu.memory_space<vmem>>) attributes {dimension_semantics = [#tpu.dimension_semantics<arbitrary>], iteration_bounds = array<i64: 1>, scalar_prefetch = 0 : i64, scratch_operands = 1 : i64, tpu.core_type = #tpu.core_type<tc>, window_params = [{transform_indices = @transform_0, window_bounds = array<i64: 16, 128>}, {transform_indices = @transform_1, window_bounds = array<i64: 16, 128>}, {transform_indices = @transform_2, window_bounds = array<i64: 16, 128>}, {pipeline_mode = #tpu.pipeline_mode<synchronous>, transform_indices = @transform_3, window_bounds = array<i64: 1, 8>}, {pipeline_mode = #tpu.pipeline_mode<synchronous>, transform_indices = @transform_4, window_bounds = array<i64: 1, 8>}, {transform_indices = @transform_5, window_bounds = array<i64: 1, 1>}, {transform_indices = @transform_6, window_bounds = array<i64: 1, 1>}]} {
    %c0_i32 = arith.constant 0 : i32
    %0 = arith.cmpi eq, %arg0, %c0_i32 : i32
    %1 = arith.extui %0 : i1 to i32
    %c0_i32_0 = arith.constant 0 : i32
    %2 = arith.cmpi ne, %1, %c0_i32_0 : i32
    scf.if %2 {
      %cst_11 = arith.constant 0.000000e+00 : f32
      %24 = vector.broadcast %cst_11 : f32 to vector<8x128xf32>
      %c0_12 = arith.constant 0 : index
      %c0_13 = arith.constant 0 : index
      %25 = vector.load %arg8[%c0_12, %c0_13] : memref<8x128xf32, #tpu.memory_space<vmem>>, vector<8x128xf32>
      tpu.vector_store %arg8[%c0_12, %c0_13], %24 {strides = array<i32>} : memref<8x128xf32, #tpu.memory_space<vmem>>, vector<8x128xf32>,
    } else {
    }
    %c0 = arith.constant 0 : index
    %c0_1 = arith.constant 0 : index
    %3 = vector.load %arg8[%c0, %c0_1] : memref<8x128xf32, #tpu.memory_space<vmem>>, vector<8x128xf32>
    %cst = arith.constant 0.000000e+00 : f32
    %4 = vector.broadcast %cst : f32 to vector<8x128xf32>
    %c0_i32_2 = arith.constant 0 : i32
    %c16_i32 = arith.constant 16 : i32
    %5 = arith.muli %c0_i32_2, %c16_i32 : i32
    %6 = tpu.assume_multiple %5, 16 : i32
    %7 = arith.index_cast %6 : i32 to index
    %c0_3 = arith.constant 0 : index
    %8 = vector.load %arg1[%7, %c0_3] : memref<16x128xf32, #tpu.memory_space<vmem>>, vector<16x128xf32>
    %9 = arith.index_cast %6 : i32 to index
    %c0_4 = arith.constant 0 : index
    %10 = vector.load %arg2[%9, %c0_4] : memref<16x128xf32, #tpu.memory_space<vmem>>, vector<16x128xf32>
    %11 = arith.index_cast %6 : i32 to index
    %c0_5 = arith.constant 0 : index
    %12 = vector.load %arg3[%11, %c0_5] : memref<16x128xf32, #tpu.memory_space<vmem>>, vector<16x128xf32>
    %13 = arith.subf %8, %10 : vector<16x128xf32>
    %14 = math.absf %13 : vector<16x128xf32>
    %15 = arith.mulf %14, %12 : vector<16x128xf32>
    %16 = vector.shape_cast %15 : vector<16x128xf32> to vector<2x8x128xf32>
    %cst_6 = arith.constant dense<0.000000e+00> : vector<8x128xf32>
    %17 = vector.multi_reduction <add>, %16, %cst_6 [0] : vector<2x8x128xf32> to vector<8x128xf32>
    %18 = arith.addf %4, %17 : vector<8x128xf32>
    %c1_i32 = arith.constant 1 : i32
    %19 = arith.addf %3, %18 : vector<8x128xf32>
    %c0_7 = arith.constant 0 : index
    %c0_8 = arith.constant 0 : index
    %20 = vector.load %arg8[%c0_7, %c0_8] : memref<8x128xf32, #tpu.memory_space<vmem>>, vector<8x128xf32>
    tpu.vector_store %arg8[%c0_7, %c0_8], %19 {strides = array<i32>} : memref<8x128xf32, #tpu.memory_space<vmem>>, vector<8x128xf32>,
    %c0_i32_9 = arith.constant 0 : i32
    %21 = arith.cmpi eq, %arg0, %c0_i32_9 : i32
    %22 = arith.extui %21 : i1 to i32
    %c0_i32_10 = arith.constant 0 : i32
    %23 = arith.cmpi ne, %22, %c0_i32_10 : i32
    scf.if %23 {
      %c0_11 = arith.constant 0 : index
      %c0_12 = arith.constant 0 : index
      %24 = vector.load %arg8[%c0_11, %c0_12] : memref<8x128xf32, #tpu.memory_space<vmem>>, vector<8x128xf32>
      %25 = vector.shape_cast %24 : vector<8x128xf32> to vector<1x8x128xf32>
      %cst_13 = arith.constant dense<0.000000e+00> : vector<1xf32>
      %26 = vector.multi_reduction <add>, %25, %cst_13 [1, 2] : vector<1x8x128xf32> to vector<1xf32>
      %27 = vector.shape_cast %26 : vector<1xf32> to vector<1x1x1xf32>
      %28 = vector.extract %27[0, 0, 0] : f32 from vector<1x1x1xf32>
      %c0_14 = arith.constant 0 : index
      %c0_15 = arith.constant 0 : index
      %29 = vector.load %arg4[%c0_14, %c0_15] : memref<1x8xf32, #tpu.memory_space<vmem>>, vector<1x8xf32>
      %c0_16 = arith.constant 0 : index
      %c0_17 = arith.constant 0 : index
      %30 = vector.load %arg5[%c0_16, %c0_17] : memref<1x8xf32, #tpu.memory_space<vmem>>, vector<1x8xf32>
      %31 = arith.mulf %29, %30 : vector<1x8xf32>
      %32 = vector.shape_cast %31 : vector<1x8xf32> to vector<1x1x8xf32>
      %cst_18 = arith.constant dense<0.000000e+00> : vector<1xf32>
      %33 = vector.multi_reduction <add>, %32, %cst_18 [1, 2] : vector<1x1x8xf32> to vector<1xf32>
      %34 = vector.shape_cast %33 : vector<1xf32> to vector<1x1x1xf32>
      %35 = vector.extract %34[0, 0, 0] : f32 from vector<1x1x1xf32>
      %cst_19 = arith.constant 1.000000e+01 : f32
      %36 = arith.subf %28, %cst_19 : f32
      %cst_20 = arith.constant 0.000000e+00 : f32
      %37 = arith.maximumf %36, %cst_20 : f32
      %cst_21 = arith.constant 5.000000e-01 : f32
      %38 = arith.mulf %cst_21, %37 : f32
      %39 = arith.addf %35, %38 : f32
      %c0_22 = arith.constant 0 : index
      %c0_23 = arith.constant 0 : index
      %40 = memref.load %arg7[%c0_22, %c0_23] : memref<1x1xf32, #tpu.memory_space<smem>>
      memref.store %28, %arg7[%c0_22, %c0_23] : memref<1x1xf32, #tpu.memory_space<smem>>
      %c0_24 = arith.constant 0 : index
      %c0_25 = arith.constant 0 : index
      %41 = memref.load %arg6[%c0_24, %c0_25] : memref<1x1xf32, #tpu.memory_space<smem>>
      memref.store %39, %arg6[%c0_24, %c0_25] : memref<1x1xf32, #tpu.memory_space<smem>>
    } else {
    }
    return
  }
  func.func @transform_0(%arg0: i32) -> (i32, i32) {
    %c0_i32 = arith.constant 0 : i32
    %c0_i32_0 = arith.constant 0 : i32
    return %arg0, %c0_i32 : i32, i32
  }
  func.func @transform_1(%arg0: i32) -> (i32, i32) {
    %c0_i32 = arith.constant 0 : i32
    %c0_i32_0 = arith.constant 0 : i32
    return %arg0, %c0_i32 : i32, i32
  }
  func.func @transform_2(%arg0: i32) -> (i32, i32) {
    %c0_i32 = arith.constant 0 : i32
    %c0_i32_0 = arith.constant 0 : i32
    return %arg0, %c0_i32 : i32, i32
  }
  func.func @transform_3(%arg0: i32) -> (i32, i32) {
    %c0_i32 = arith.constant 0 : i32
    %c0_i32_0 = arith.constant 0 : i32
    %c0_i32_1 = arith.constant 0 : i32
    return %c0_i32, %c0_i32_0 : i32, i32
  }
  func.func @transform_4(%arg0: i32) -> (i32, i32) {
    %c0_i32 = arith.constant 0 : i32
    %c0_i32_0 = arith.constant 0 : i32
    %c0_i32_1 = arith.constant 0 : i32
    return %c0_i32, %c0_i32_0 : i32, i32
  }
  func.func @transform_5(%arg0: i32) -> (i32, i32) {
    %c0_i32 = arith.constant 0 : i32
    %c0_i32_0 = arith.constant 0 : i32
    %c0_i32_1 = arith.constant 0 : i32
    return %c0_i32, %c0_i32_0 : i32, i32
  }
  func.func @transform_6(%arg0: i32) -> (i32, i32) {
    %c0_i32 = arith.constant 0 : i32
    %c0_i32_0 = arith.constant 0 : i32
    %c0_i32_1 = arith.constant 0 : i32
    return %c0_i32, %c0_i32_0 : i32, i32
  }
}

</mosaic_0001>

<bundles_post_ra>
// kernel: tpu_custom_call.1
= control target key start
LH: loop header
LB: loop body
LE: loop exit
PB: predicated region body
PF: predicated region fallthrough
CT: control target
= control target key end

     0   :  { %12 = vsyncpa [#allocation4], 0  ;;  %s310_s0 = inlined_call_operand.hbm [shape: f32[16,128], index: 0, kind: input, shape index: {}]   ;;  %s311_s1 = inlined_call_operand.hbm [shape: f32[16,128], index: 1, kind: input, shape index: {}]   ;;  %s312_s2 = inlined_call_operand.hbm [shape: f32[16,128], index: 2, kind: input, shape index: {}]   ;;  %s313_s3 = inlined_call_operand.vmem [shape: f32[1,8], index: 3, kind: input, shape index: {}]   ;;  %s314_s4 = inlined_call_operand.vmem [shape: f32[1,8], index: 4, kind: input, shape index: {}]   ;;  %s315_s5 = inlined_call_operand.hbm [shape: f32[1,1], index: 5, kind: output, shape index: {0}]   ;;  %s316_s6 = inlined_call_operand.hbm [shape: f32[1,1], index: 6, kind: output, shape index: {1}]  }
   0x1   :  { %13 = vsyncpa [#allocation7], 0 }
   0x2   :  { %14 = vsyncpa [#allocation5], 0 }
   0x3   :  { %15 = vsyncpa [#allocation11], 0  ;;  %s246_s21 = smov [#allocation6]   ;;  %s247_s23 = smov [#allocation3]  }
   0x4   :  { %s33_s22 = sshll.u32 %s246_s21, 4  ;;  %s21_s24 = sshll.u32 %s247_s23, 4  ;;  %s34_s22 = int_to_ptr.vmem [resolvable:$true] %s33_s22  ;;  %s22_s24 = int_to_ptr.vmem [resolvable:$true] %s21_s24 }
   0x5   :  { %s170_s25 = scalar_lea.vmem %s34_s22, 256  ;;  %p175_p1 = scmp.lt.s32.totalorder %s34_s22, %s34_s22 }
   0x6   :  { %p171_p0 = scmp.ne.s32.totalorder %s34_s22, %s170_s25  ;;  %p176_p2 = scmp.lt.s32.totalorder %s170_s25, %s170_s25 }
   0x8   :  { %p177_p3 = por %p176_p2, %p175_p1 }
   0xa   :  { %p178_p4 = pnand %p177_p3, %p171_p0 }
   0xc   :  { %181 = shalt.err (!%p178_p4)
}
   0xd   :  { %s248_s26 = smov 128   ;;  %s249_s27 = smov 8  }
   0xe   :  { %39 = dma.hbm_to_vmem [thread:$0]  %s311_s1, 256, %s34_s22, [#allocation7], %s248_s26, %s248_s26, %s249_s27  }
   0xf   :  { %s190_s30 = scalar_lea.vmem %s22_s24, 256  ;;  %p195_p6 = scmp.lt.s32.totalorder %s22_s24, %s22_s24 }
  0x10   :  { %p191_p5 = scmp.ne.s32.totalorder %s22_s24, %s190_s30  ;;  %p196_p7 = scmp.lt.s32.totalorder %s190_s30, %s190_s30 }
  0x12   :  { %p197_p8 = por %p196_p7, %p195_p6 }
  0x14   :  { %p198_p9 = pnand %p197_p8, %p191_p5 }
  0x16   :  { %201 = shalt.err (!%p198_p9)
}
  0x17   :  { %27 = dma.hbm_to_vmem [thread:$0]  %s310_s0, 256, %s22_s24, [#allocation4], %s248_s26, %s248_s26, %s249_s27  }
  0x18   :  { %s250_s9 = smov [#allocation8]  }
  0x19   :  { %s45_s10 = sshll.u32 %s250_s9, 4  ;;  %s46_s10 = int_to_ptr.vmem [resolvable:$true] %s45_s10 }
  0x1a   :  { %s210_s11 = scalar_lea.vmem %s46_s10, 256  ;;  %p215_p11 = scmp.lt.s32.totalorder %s46_s10, %s46_s10 }
  0x1b   :  { %p211_p10 = scmp.ne.s32.totalorder %s46_s10, %s210_s11  ;;  %p216_p12 = scmp.lt.s32.totalorder %s210_s11, %s210_s11 }
  0x1d   :  { %p217_p13 = por %p216_p12, %p215_p11 }
  0x1f   :  { %p218_p0 = pnand %p217_p13, %p211_p10 }
  0x21   :  { %221 = shalt.err (!%p218_p0)
}
  0x22   :  { %51 = dma.hbm_to_vmem [thread:$0]  %s312_s2, 256, %s46_s10, [#allocation7], %s248_s26, %s248_s26, %s249_s27  }
  0x23   :  { %238 = dma.done.wait [#allocation4], 256  }
  0x24   :  { %239 = vsyncadd [#allocation4], 4294967040 }
  0x25   :  { %240 = dma.done.wait [#allocation7], 512  }
  0x26   :  { %241 = vsyncadd [#allocation7], 4294966784  ;;  %v71_v0 = vld [vmem:[#allocation3] sm:$0xff]  ;;  %v72_v1 = vld [vmem:[#allocation3 + $0x8] sm:$0xff]  ;;  %vm103_vm0 = vcmask 57344   ;;  %s251_s15 = smov 0.0  }
  0x27   :  { %v73_v2 = vld [vmem:[#allocation6] sm:$0xff]  ;;  %v74_v3 = vld [vmem:[#allocation6 + $0x8] sm:$0xff]  ;;  %v75_v5 = vld [vmem:[#allocation8] sm:$0xff]  ;;  %s252_s19 = smov [#allocation10]   ;;  %s253_s23 = smov [#allocation9]  }
  0x28   :  { %v77_v4 = vsub.f32 %v71_v0, %v73_v2  ;;  %v78_v6 = vsub.f32 %v72_v1, %v74_v3  ;;  %v76_v7 = vld [vmem:[#allocation8 + $0x8] sm:$0xff]  ;;  %v100_v10 = vld [vmem:[%s313_s3] sm:$0x1] }
  0x29   :  { %v101_v11 = vld [vmem:[%s314_s4] sm:$0x1] }
  0x2a   :  { %v79_v8 = vand.u32 2147483647, %v77_v4  ;;  %v80_v9 = vand.u32 2147483647, %v78_v6  ;;  %v102_v14 = vmul.f32 %v101_v11, %v100_v10 }
  0x2c   :  { %v81_v12 = vmul.f32 %v79_v8, %v75_v5  ;;  %v82_v13 = vmul.f32 %v80_v9, %v76_v7  ;;  %v104_v16 = vsel %vm103_vm0, %v102_v14, 0.0 }
  0x2e   :  { %v83_v15 = vadd.f32 %v82_v13, %v81_v12 }
  0x30   :  { %91 = vadd.xlane.f32.xlu0 %v83_v15 }
  0x34   :  { %105 = vadd.xlane.f32.xlu0 %v104_v16 }
  0xb9   :  { %v92_v17 = vpop.xlane.xlu0 %91 }
  0xba   :  { %v93_v18 = vrot.slane %v92_v17, 4 }
  0xbc   :  { %v94_v19 = vadd.f32 %v93_v18, %v92_v17 }
  0xbd   :  { %v106_v20 = vpop.xlane.xlu0 %105 }
  0xbe   :  { %v95_v21 = vrot.slane %v94_v19, 2  ;;  %v107_v22 = vrot.slane %v106_v20, 4 }
  0xc0   :  { %v108_v23 = vadd.f32 %v107_v22, %v106_v20  ;;  %v96_v24 = vadd.f32 %v95_v21, %v94_v19 }
  0xc2   :  { %v109_v25 = vrot.slane %v108_v23, 2  ;;  %v97_v26 = vrot.slane %v96_v24, 1 }
  0xc4   :  { %v110_v27 = vadd.f32 %v109_v25, %v108_v23  ;;  %v98_v28 = vadd.f32 %v97_v26, %v96_v24 }
  0xc6   :  { %150 = vpush %v98_v28  ;;  %v111_v29 = vrot.slane %v110_v27, 1 }
  0xc8   :  { %v112_v30 = vadd.f32 %v111_v29, %v110_v27 }
  0xca   :  { %152 = vpush %v112_v30 }
  0xf7   :  { %s151_s3 = spop %150 }
  0xf8   :  { %s149_s4 = sadd.f32 -10.0, %s151_s3 }
  0xf9   :  { %119 = sst [smem:[#allocation10]] %s151_s3 }
  0xfa   :  { %s115_s16 = smax.f32 %s251_s15, %s149_s4 }
  0xfb   :  { %s153_s17 = spop %152  ;;  %s116_s18 = smul.f32 0.5, %s115_s16 }
  0xfc   :  { %137 = dma.smem_to_hbm %s252_s19, 16, %s316_s6, [#allocation11]  }
  0xfd   :  { %s117_s22 = sadd.f32 %s153_s17, %s116_s18 }
  0xff   :  { %121 = sst [smem:[#allocation9]] %s117_s22 }
 0x100   :  { %129 = dma.smem_to_hbm %s253_s23, 16, %s315_s5, [#allocation5]  }
 0x101   :  { %242 = dma.done.wait [#allocation5], 16  }
 0x102   :  { %243 = vsyncadd [#allocation5], 4294967280 }
 0x103   :  { %244 = dma.done.wait [#allocation11], 16  }
 0x104   :  { %245 = vsyncadd [#allocation11], 4294967280 }
 0x105   :  { %144 = sfence }
 0x106   :  { %145 = vsyncpa [#allocation4], 1 }
 0x107   :  { %146 = vsyncpa [#allocation7], 1 }
 0x108   :  { %147 = vsyncpa [#allocation5], 1 }
 0x109   :  { %148 = vsyncpa [#allocation11], 1 }

</bundles_post_ra>
